<compile_context>
chip_gen: v6e
topology: v6e:2x2x1
jax: 0.10.0
libtpu: 0.0.40
codegen_flags: <defaults>
</compile_context>

<pallas_src>
import functools

import jax
import jax.numpy as jnp
from jax.experimental import pallas as pl
from jax.experimental.pallas import tpu as pltpu

IMG_FEATURE_SIZE = 256
QUESTION_FEATURE_SIZE = 128
OUTPUT_SIZE = 128


def vqa_fused_kernel(img_ref, q_ref, a_img_ref, a_q_ref, c_ref, out_ref):
    # In-kernel f32 -> bf16 cast (VPU), two independent MXU matmuls with f32
    # accumulation, f32 bias add, single lane-dense store.
    img_bf16 = img_ref[...].astype(jnp.bfloat16)
    q_bf16 = q_ref[...].astype(jnp.bfloat16)
    acc = jnp.dot(img_bf16, a_img_ref[...], preferred_element_type=jnp.float32)
    acc = acc + jnp.dot(q_bf16, a_q_ref[...], preferred_element_type=jnp.float32)
    out_ref[...] = (acc + c_ref[...]).astype(out_ref.dtype)


def fuse_params(params, weight_dtype=jnp.bfloat16):
    """Collapse the three Linears (no nonlinearity) into one affine map.

        out = img @ A_img + q @ A_q + c
    with A_img = W_img @ W_fc[:128], A_q = W_q @ W_fc[128:],
         c = b_img @ W_fc[:128] + b_q @ W_fc[128:] + b_fc.
    """
    w_img, b_img, w_q, b_q, w_fc, b_fc = params
    w_fc_img = w_fc[:OUTPUT_SIZE]
    w_fc_q = w_fc[OUTPUT_SIZE:]
    a_img = (w_img @ w_fc_img).astype(weight_dtype)                 # [256, 128]
    a_q = (w_q @ w_fc_q).astype(weight_dtype)                       # [128, 128]
    c = (b_img @ w_fc_img + b_q @ w_fc_q + b_fc).astype(jnp.float32)  # [1, 128]
    return a_img, a_q, c


def _round_up(x, m):
    return ((x + m - 1) // m) * m


def _choose_tiling(B, max_tile, min_rows_to_split=1024):
    """Balanced batch tiles: bounds padding waste to <8 rows per tile."""
    num_tiles = pl.cdiv(B, max_tile)
    # v7x has 2 TensorCores; give the "parallel" batch axis >=2 grid steps once
    # there is enough work to split.  Harmless (still 1 step) for small B.
    if num_tiles < 2 and B >= min_rows_to_split:
        num_tiles = 2
    tb = _round_up(pl.cdiv(B, num_tiles), 8)
    Bp = num_tiles * tb
    return num_tiles, tb, Bp


def vqa_forward_fused(fused_params, img_feature, question_feature,
                      *, max_tile=1024, out_dtype=jnp.float32):
    """img_feature: [B, 256] f32, question_feature: [B, 128] f32 -> [B, 128]."""
    a_img, a_q, c = fused_params
    B = img_feature.shape[0]
    num_tiles, tb, Bp = _choose_tiling(B, max_tile)

    img = img_feature
    q = question_feature
    if Bp != B:
        # Padding is bounded to <8 rows per tile by _choose_tiling; padded
        # output rows are sliced off below and never read downstream.
        img = jnp.pad(img, ((0, Bp - B), (0, 0)))
        q = jnp.pad(q, ((0, Bp - B), (0, 0)))

    out = pl.pallas_call(
        vqa_fused_kernel,
        out_shape=jax.ShapeDtypeStruct((Bp, OUTPUT_SIZE), out_dtype),
        grid=(num_tiles,),
        in_specs=[
            # Batch-tiled f32 activations (auto double-buffered across grid).
            pl.BlockSpec((tb, IMG_FEATURE_SIZE), lambda i: (i, 0)),
            pl.BlockSpec((tb, QUESTION_FEATURE_SIZE), lambda i: (i, 0)),
            # Fused weights / bias: constant block index -> stay VMEM-resident.
            pl.BlockSpec((IMG_FEATURE_SIZE, OUTPUT_SIZE), lambda i: (0, 0)),
            pl.BlockSpec((QUESTION_FEATURE_SIZE, OUTPUT_SIZE), lambda i: (0, 0)),
            pl.BlockSpec((1, OUTPUT_SIZE), lambda i: (0, 0)),
        ],
        out_specs=pl.BlockSpec((tb, OUTPUT_SIZE), lambda i: (i, 0)),
        compiler_params=pltpu.CompilerParams(
            dimension_semantics=("parallel",)),
    )(img, q, a_img, a_q, c)

    if Bp != B:
        out = out[:B]
    return out


def make_vqa_forward(params, *, max_tile=1024, out_dtype=jnp.float32):
    """Fuse the three Linears once (not per call) and return a jitted forward."""
    fused = fuse_params(params)
    fwd = functools.partial(vqa_forward_fused, max_tile=max_tile,
                            out_dtype=out_dtype)
    return jax.jit(lambda img, q: fwd(fused, img, q))


def init_params(key):
    """Deterministic init mirroring nn.Linear (uniform +/- 1/sqrt(fan_in)).

    Weights stored [in_features, out_features] (transposed vs PyTorch);
    biases stored as [1, out_features].
    """
    ks = jax.random.split(key, 6)

    def linear(kw, kb, fan_in, fan_out):
        bound = 1.0 / jnp.sqrt(jnp.float32(fan_in))
        w = jax.random.uniform(kw, (fan_in, fan_out), jnp.float32, -bound, bound)
        b = jax.random.uniform(kb, (1, fan_out), jnp.float32, -bound, bound)
        return w, b

    w_img, b_img = linear(ks[0], ks[1], IMG_FEATURE_SIZE, OUTPUT_SIZE)
    w_q, b_q = linear(ks[2], ks[3], QUESTION_FEATURE_SIZE, OUTPUT_SIZE)
    w_fc, b_fc = linear(ks[4], ks[5], 2 * OUTPUT_SIZE, OUTPUT_SIZE)
    return (w_img, b_img, w_q, b_q, w_fc, b_fc)


def vqa_reference(img_feature, question_feature, params):
    """Pure-JAX f32 reference (identical math to the PyTorch forward)."""
    w_img, b_img, w_q, b_q, w_fc, b_fc = params
    img_out = img_feature @ w_img + b_img
    q_out = question_feature @ w_q + b_q
    combined = jnp.concatenate([img_out, q_out], axis=1)
    return combined @ w_fc + b_fc


if __name__ == "__main__":
    key = jax.random.PRNGKey(0)
    k_img, k_q, k_params = jax.random.split(key, 3)

    B = 8  # small batch for the smoke test
    img = jax.random.normal(k_img, (B, IMG_FEATURE_SIZE), jnp.float32)
    question = jax.random.normal(k_q, (B, QUESTION_FEATURE_SIZE), jnp.float32)
    params = init_params(k_params)

    forward = make_vqa_forward(params)   # fuses weights once, jitted forward
    out = forward(img, question)
    out = jax.block_until_ready(out)

    ref = vqa_reference(img, question, params)
    assert out.shape == (B, OUTPUT_SIZE), out.shape
    # bf16 MXU inputs (f32 accumulation) -> loosen tolerance vs f32 reference.
    assert jnp.allclose(out, ref, atol=3e-2, rtol=3e-2), (
        float(jnp.max(jnp.abs(out - ref))))

    print("KERNEL_OK")
</pallas_src>

<mosaic_0001>
module attributes {stable_mosaic.version = 11 : i64} {
  func.func @vqa_fused_kernel(%arg0: i32, %arg1: memref<8x256xf32, #tpu.memory_space<vmem>>, %arg2: memref<8x128xf32, #tpu.memory_space<vmem>>, %arg3: memref<256x128xbf16, #tpu.memory_space<vmem>>, %arg4: memref<128x128xbf16, #tpu.memory_space<vmem>>, %arg5: memref<1x128xf32, #tpu.memory_space<vmem>>, %arg6: memref<8x128xf32, #tpu.memory_space<vmem>>) attributes {dimension_semantics = [#tpu.dimension_semantics<parallel>], iteration_bounds = array<i64: 1>, scalar_prefetch = 0 : i64, scratch_operands = 0 : i64, tpu.core_type = #tpu.core_type<tc>, window_params = [{transform_indices = @transform_0, window_bounds = array<i64: 8, 256>}, {transform_indices = @transform_1, window_bounds = array<i64: 8, 128>}, {pipeline_mode = #tpu.pipeline_mode<synchronous>, transform_indices = @transform_2, window_bounds = array<i64: 256, 128>}, {pipeline_mode = #tpu.pipeline_mode<synchronous>, transform_indices = @transform_3, window_bounds = array<i64: 128, 128>}, {pipeline_mode = #tpu.pipeline_mode<synchronous>, transform_indices = @transform_4, window_bounds = array<i64: 1, 128>}, {transform_indices = @transform_5, window_bounds = array<i64: 8, 128>}]} {
    %c0 = arith.constant 0 : index
    %c0_0 = arith.constant 0 : index
    %0 = vector.load %arg1[%c0, %c0_0] : memref<8x256xf32, #tpu.memory_space<vmem>>, vector<8x256xf32>
    %1 = arith.truncf %0 : vector<8x256xf32> to vector<8x256xbf16>
    %c0_1 = arith.constant 0 : index
    %c0_2 = arith.constant 0 : index
    %2 = vector.load %arg2[%c0_1, %c0_2] : memref<8x128xf32, #tpu.memory_space<vmem>>, vector<8x128xf32>
    %3 = arith.truncf %2 : vector<8x128xf32> to vector<8x128xbf16>
    %c0_3 = arith.constant 0 : index
    %c0_4 = arith.constant 0 : index
    %4 = vector.load %arg3[%c0_3, %c0_4] : memref<256x128xbf16, #tpu.memory_space<vmem>>, vector<256x128xbf16>
    %cst = arith.constant dense<0.000000e+00> : vector<8x128xf32>
    %5 = tpu.matmul %1, %4, %cst {dimension_numbers = #tpu.dot_dimension_numbers<[1], [0], [0], [1], [0, 0, 1, 1], [], []>} : vector<8x256xbf16>, vector<256x128xbf16>, vector<8x128xf32> -> vector<8x128xf32>
    %c0_5 = arith.constant 0 : index
    %c0_6 = arith.constant 0 : index
    %6 = vector.load %arg4[%c0_5, %c0_6] : memref<128x128xbf16, #tpu.memory_space<vmem>>, vector<128x128xbf16>
    %cst_7 = arith.constant dense<0.000000e+00> : vector<8x128xf32>
    %7 = tpu.matmul %3, %6, %cst_7 {dimension_numbers = #tpu.dot_dimension_numbers<[1], [0], [0], [1], [0, 0, 1, 1], [], []>} : vector<8x128xbf16>, vector<128x128xbf16>, vector<8x128xf32> -> vector<8x128xf32>
    %8 = arith.addf %5, %7 : vector<8x128xf32>
    %c0_8 = arith.constant 0 : index
    %c0_9 = arith.constant 0 : index
    %9 = vector.load %arg5[%c0_8, %c0_9] : memref<1x128xf32, #tpu.memory_space<vmem>>, vector<1x128xf32>
    %10 = vector.broadcast %9 : vector<1x128xf32> to vector<8x128xf32>
    %11 = arith.addf %8, %10 : vector<8x128xf32>
    %c0_10 = arith.constant 0 : index
    %c0_11 = arith.constant 0 : index
    %12 = vector.load %arg6[%c0_10, %c0_11] : memref<8x128xf32, #tpu.memory_space<vmem>>, vector<8x128xf32>
    tpu.vector_store %arg6[%c0_10, %c0_11], %11 {strides = array<i32>} : memref<8x128xf32, #tpu.memory_space<vmem>>, vector<8x128xf32>,
    return
  }
  func.func @transform_0(%arg0: i32) -> (i32, i32) {
    %c0_i32 = arith.constant 0 : i32
    %c0_i32_0 = arith.constant 0 : i32
    return %arg0, %c0_i32 : i32, i32
  }
  func.func @transform_1(%arg0: i32) -> (i32, i32) {
    %c0_i32 = arith.constant 0 : i32
    %c0_i32_0 = arith.constant 0 : i32
    return %arg0, %c0_i32 : i32, i32
  }
  func.func @transform_2(%arg0: i32) -> (i32, i32) {
    %c0_i32 = arith.constant 0 : i32
    %c0_i32_0 = arith.constant 0 : i32
    %c0_i32_1 = arith.constant 0 : i32
    return %c0_i32, %c0_i32_0 : i32, i32
  }
  func.func @transform_3(%arg0: i32) -> (i32, i32) {
    %c0_i32 = arith.constant 0 : i32
    %c0_i32_0 = arith.constant 0 : i32
    %c0_i32_1 = arith.constant 0 : i32
    return %c0_i32, %c0_i32_0 : i32, i32
  }
  func.func @transform_4(%arg0: i32) -> (i32, i32) {
    %c0_i32 = arith.constant 0 : i32
    %c0_i32_0 = arith.constant 0 : i32
    %c0_i32_1 = arith.constant 0 : i32
    return %c0_i32, %c0_i32_0 : i32, i32
  }
  func.func @transform_5(%arg0: i32) -> (i32, i32) {
    %c0_i32 = arith.constant 0 : i32
    %c0_i32_0 = arith.constant 0 : i32
    return %arg0, %c0_i32 : i32, i32
  }
}

</mosaic_0001>

<bundles_post_ra>
// kernel: _lambda_.1
= control target key start
LH: loop header
LB: loop body
LE: loop exit
PB: predicated region body
PF: predicated region fallthrough
CT: control target
= control target key end

     0   :  { %10 = vsyncpa [#allocation3], 0  ;;  %s651_s0 = inlined_call_operand.hbm [shape: f32[8,256], index: 0, kind: input, shape index: {}]   ;;  %s652_s1 = inlined_call_operand.hbm [shape: f32[8,128], index: 1, kind: input, shape index: {}]   ;;  %s653_s2 = inlined_call_operand.hbm [shape: bf16[256,128], index: 2, kind: input, shape index: {}]   ;;  %s654_s3 = inlined_call_operand.hbm [shape: bf16[128,128], index: 3, kind: input, shape index: {}]   ;;  %s655_s4 = inlined_call_operand.vmem [shape: f32[1,128], index: 4, kind: input, shape index: {}]   ;;  %s656_s5 = inlined_call_operand.hbm [shape: f32[8,128], index: 5, kind: output, shape index: {}]  }
   0x1   :  { %11 = vsyncpa [#allocation6], 0 }
   0x2   :  { %12 = vsyncpa [#allocation9], 0 }
   0x3   :  { %13 = vsyncpa [#allocation4], 0  ;;  %s594_s18 = smov [#allocation5]   ;;  %s595_s20 = smov [#allocation2]  }
   0x4   :  { %s30_s19 = sshll.u32 %s594_s18, 4  ;;  %s20_s21 = sshll.u32 %s595_s20, 4  ;;  %s31_s19 = int_to_ptr.vmem [resolvable:$true] %s30_s19  ;;  %s21_s21 = int_to_ptr.vmem [resolvable:$true] %s20_s21 }
   0x5   :  { %s494_s22 = scalar_lea.vmem %s31_s19, 128  ;;  %p499_p1 = scmp.lt.s32.totalorder %s31_s19, %s31_s19 }
   0x6   :  { %p495_p0 = scmp.ne.s32.totalorder %s31_s19, %s494_s22  ;;  %p500_p2 = scmp.lt.s32.totalorder %s494_s22, %s494_s22 }
   0x8   :  { %p501_p3 = por %p500_p2, %p499_p1 }
   0xa   :  { %p502_p4 = pnand %p501_p3, %p495_p0 }
   0xc   :  { %505 = shalt.err (!%p502_p4)
}
   0xd   :  { %33 = dma.hbm_to_vmem [thread:$0]  %s652_s1, 128, %s31_s19, [#allocation6]  }
   0xe   :  { %s514_s25 = scalar_lea.vmem %s21_s21, 256  ;;  %p519_p6 = scmp.lt.s32.totalorder %s21_s21, %s21_s21 }
   0xf   :  { %p515_p5 = scmp.ne.s32.totalorder %s21_s21, %s514_s25  ;;  %p520_p7 = scmp.lt.s32.totalorder %s514_s25, %s514_s25 }
  0x11   :  { %p521_p8 = por %p520_p7, %p519_p6 }
  0x13   :  { %p522_p9 = pnand %p521_p8, %p515_p5 }
  0x15   :  { %525 = shalt.err (!%p522_p9)
}
  0x16   :  { %23 = dma.hbm_to_vmem [thread:$0]  %s651_s0, 256, %s21_s21, [#allocation3]  }
  0x17   :  { %s596_s28 = smov [#allocation7]  }
  0x18   :  { %s39_s29 = sshll.u32 %s596_s28, 4  ;;  %s40_s29 = int_to_ptr.vmem [resolvable:$true] %s39_s29 }
  0x19   :  { %s534_s30 = scalar_lea.vmem %s40_s29, 2048  ;;  %p539_p11 = scmp.lt.s32.totalorder %s40_s29, %s40_s29 }
  0x1a   :  { %p535_p10 = scmp.ne.s32.totalorder %s40_s29, %s534_s30  ;;  %p540_p12 = scmp.lt.s32.totalorder %s534_s30, %s534_s30 }
  0x1c   :  { %p541_p13 = por %p540_p12, %p539_p11 }
  0x1e   :  { %p542_p0 = pnand %p541_p13, %p535_p10 }
  0x20   :  { %545 = shalt.err (!%p542_p0)
}
  0x21   :  { %s597_s1 = smov 64   ;;  %s598_s6 = smov 4  }
  0x22   :  { %45 = dma.hbm_to_vmem [thread:$0]  %s653_s2, 2048, %s40_s29, [#allocation6], %s597_s1, %s597_s1, %s598_s6  }
  0x23   :  { %s599_s9 = smov [#allocation8]  }
  0x24   :  { %s51_s10 = sshll.u32 %s599_s9, 4  ;;  %s52_s10 = int_to_ptr.vmem [resolvable:$true] %s51_s10 }
  0x25   :  { %s554_s0 = scalar_lea.vmem %s52_s10, 1024  ;;  %p559_p2 = scmp.lt.s32.totalorder %s52_s10, %s52_s10 }
  0x26   :  { %p555_p1 = scmp.ne.s32.totalorder %s52_s10, %s554_s0  ;;  %p560_p3 = scmp.lt.s32.totalorder %s554_s0, %s554_s0 }
  0x28   :  { %p561_p4 = por %p560_p3, %p559_p2 }
  0x2a   :  { %p562_p5 = pnand %p561_p4, %p555_p1 }
  0x2c   :  { %565 = shalt.err (!%p562_p5)
}
  0x2d   :  { %57 = dma.hbm_to_vmem [thread:$0]  %s654_s3, 1024, %s52_s10, [#allocation9], %s597_s1, %s597_s1, %s598_s6  }
  0x2e   :  { %586 = dma.done.wait [#allocation3], 256  }
  0x2f   :  { %587 = vsyncadd [#allocation3], 4294967040 }
  0x30   :  { %588 = dma.done.wait [#allocation6], 2176  }
  0x31   :  { %589 = vsyncadd [#allocation6], 4294965120 }
  0x32   :  { %590 = dma.done.wait [#allocation9], 1024  }
  0x33   :  { %591 = vsyncadd [#allocation9], 4294966272  ;;  %v600_v0 = vmov 0.0   ;;  %vm601_vm0 = vmmov 0   ;;  %v462_v1 = vld [vmem:[#allocation8 + $0x38] sm:$0xff]   ;;  %v465_v4 = vld [vmem:[#allocation8 + $0x30] sm:$0xff]  }
  0x34   :  { %433 = vmatprep.subr.bf16.mxu0 %v600_v0  ;;  %449 = vmatprep.mubr.msk.bf16.mxu0 %vm601_vm0, %v600_v0  ;;  %v463_v2 = vld [vmem:[#allocation7 + $0x78] sm:$0xff]   ;;  %v466_v5 = vld [vmem:[#allocation7 + $0x70] sm:$0xff]   ;;  %v468_v7 = vld [vmem:[#allocation8 + $0x28] sm:$0xff]   ;;  %s602_s13 = smov [#allocation10]  }
  0x35   :  { %434 = vmatpush3.bf16.msra.mxu0 %v462_v1  ;;  %v464_v3 = vld [vmem:[#allocation7 + $0x38] sm:$0xff]   ;;  %411 = vmatprep.subr.bf16.mxu1 %v463_v2  ;;  %v467_v6 = vld [vmem:[#allocation7 + $0x30] sm:$0xff]   ;;  %v469_v8 = vld [vmem:[#allocation7 + $0x68] sm:$0xff]   ;;  %s366_s14 = sshll.u32 %s602_s13, 4  ;;  %s367_s14 = int_to_ptr.vmem [resolvable:$true] %s366_s14 }
  0x36   :  { %435 = vmatprep.subr.bf16.mxu0 %v600_v0  ;;  %412 = vmatpush3.bf16.msra.mxu1 %v464_v3  ;;  %v470_v9 = vld [vmem:[#allocation7 + $0x28] sm:$0xff]   ;;  %v471_v10 = vld [vmem:[#allocation8 + $0x20] sm:$0xff]   ;;  %v475_v13 = vld [vmem:[#allocation7 + $0x58] sm:$0xff]   ;;  %s566_s15 = scalar_lea.vmem %s367_s14, 128  ;;  %p571_p7 = scmp.lt.s32.totalorder %s367_s14, %s367_s14 }
  0x37   :  { %413 = vmatprep.subr.bf16.mxu1 %v466_v5  ;;  %v472_v11 = vld [vmem:[#allocation7 + $0x60] sm:$0xff]   ;;  %v474_v14 = vld [vmem:[#allocation8 + $0x18] sm:$0xff]   ;;  %v478_v16 = vld [vmem:[#allocation7 + $0x50] sm:$0xff]   ;;  %p567_p6 = scmp.ne.s32.totalorder %s367_s14, %s566_s15  ;;  %p572_p8 = scmp.lt.s32.totalorder %s566_s15, %s566_s15 }
  0x38   :  { %v473_v12 = vld [vmem:[#allocation7 + $0x20] sm:$0xff]   ;;  %v476_v15 = vld [vmem:[#allocation7 + $0x18] sm:$0xff]   ;;  %v477_v17 = vld [vmem:[#allocation8 + $0x10] sm:$0xff]  }
  0x39   :  { %436 = vmatpush3.bf16.msra.mxu0 %v465_v4  ;;  %v479_v18 = vld [vmem:[#allocation7 + $0x10] sm:$0xff]   ;;  %v481_v19 = vld [vmem:[#allocation7 + $0x48] sm:$0xff]   ;;  %v484_v23 = vld [vmem:[#allocation7 + $0x40] sm:$0xff]   ;;  %p573_p9 = por %p572_p8, %p571_p7 }
  0x3a   :  { %437 = vmatprep.subr.bf16.mxu0 %v600_v0  ;;  %414 = vmatpush3.bf16.msra.mxu1 %v467_v6  ;;  %v480_v20 = vld [vmem:[#allocation8 + $0x8] sm:$0xff]   ;;  %v74_v22 = vld [vmem:[#allocation2 + $0x8] sm:$0xff]  ;;  %v483_v25 = vld [vmem:[#allocation8] sm:$0xff]  }
  0x3b   :  { %415 = vmatprep.subr.bf16.mxu1 %v469_v8  ;;  %v482_v21 = vld [vmem:[#allocation7 + $0x8] sm:$0xff]   ;;  %v76_v24 = vpack.c.bf16 %v74_v22, %v74_v22  ;;  %v77_v26 = vld [vmem:[#allocation5] sm:$0xff]  ;;  %v485_v27 = vld [vmem:[#allocation7] sm:$0xff]   ;;  %p574_p10 = pnand %p573_p9, %p567_p6 }
  0x3c   :  { %v73_v28 = vld [vmem:[#allocation2] sm:$0xff]  ;;  %v78_v29 = vpack.c.bf16 %v77_v26, %v77_v26 }
  0x3d   :  { %438 = vmatpush3.bf16.msra.mxu0 %v468_v7  ;;  %343 = vmatprep.mubr.bf16.mxu1 %v76_v24  ;;  %v75_v30 = vpack.c.bf16 %v73_v28, %v73_v28  ;;  %v401_v39 = vld [vmem:[%s655_s4] ss:$0 sm:$0xff] }
  0x3e   :  { %439 = vmatprep.subr.bf16.mxu0 %v600_v0  ;;  %416 = vmatpush3.bf16.msra.mxu1 %v470_v9 }
  0x3f   :  { %417 = vmatprep.subr.bf16.mxu1 %v472_v11 }
  0x41   :  { %440 = vmatpush3.bf16.msra.mxu0 %v471_v10 }
  0x42   :  { %441 = vmatprep.subr.bf16.mxu0 %v600_v0  ;;  %418 = vmatpush3.bf16.msra.mxu1 %v473_v12 }
  0x43   :  { %419 = vmatprep.subr.bf16.mxu1 %v475_v13 }
  0x45   :  { %442 = vmatpush3.bf16.msra.mxu0 %v474_v14 }
  0x46   :  { %443 = vmatprep.subr.bf16.mxu0 %v600_v0  ;;  %420 = vmatpush3.bf16.msra.mxu1 %v476_v15 }
  0x47   :  { %421 = vmatprep.subr.bf16.mxu1 %v478_v16 }
  0x49   :  { %444 = vmatpush3.bf16.msra.mxu0 %v477_v17 }
  0x4a   :  { %445 = vmatprep.subr.bf16.mxu0 %v600_v0  ;;  %422 = vmatpush3.bf16.msra.mxu1 %v479_v18 }
  0x4b   :  { %423 = vmatprep.subr.bf16.mxu1 %v481_v19 }
  0x4d   :  { %446 = vmatpush3.bf16.msra.mxu0 %v480_v20 }
  0x4e   :  { %447 = vmatprep.subr.bf16.mxu0 %v600_v0  ;;  %424 = vmatpush3.bf16.msra.mxu1 %v482_v21 }
  0x4f   :  { %425 = vmatprep.subr.bf16.mxu1 %v484_v23 }
  0x51   :  { %448 = vmatpush3.bf16.msra.mxu0 %v483_v25 }
  0x52   :  { %426 = vmatpush3.bf16.msra.mxu1 %v485_v27 }
  0x54   :  { %450 = vmatmul.mubr.bf16.vlgmr.msra.gmra.mxu0 %v78_v29 }
  0x55   :  { %344 = vmatmul.mubr.bf16.vlgmr.msra.gmra.mxu1 %v75_v30 }
 0x114   :  { %v209_v31 = vpop.f32.mrf.mxu0 }
 0x115   :  { %v427_v32 = vpop.f32.mrf.mxu1 }
 0x116   :  { %v451_v33 = vpop.f32.mrf.mxu0 }
 0x117   :  { %v428_v34 = vpop.f32.mrf.mxu1 }
 0x118   :  { %v212_v35 = vpop.f32.mrf.mxu0  ;;  %v429_v36 = vadd.f32 %v428_v34, %v427_v32 }
 0x119   :  { %v430_v37 = vpop.f32.mrf.mxu1 }
 0x11a   :  { %v452_v38 = vpop.f32.mrf.mxu0  ;;  %v346_v40 = vadd.f32 %v429_v36, %v209_v31 }
 0x11b   :  { %v431_v41 = vpop.f32.mrf.mxu1 }
 0x11c   :  { %v358_v42 = vadd.f32 %v401_v39, %v346_v40 }
 0x11e   :  { %359 = vst [vmem:[#allocation10] sm:$0xff] %v358_v42 }
 0x11f   :  { %577 = shalt.err (!%p574_p10)
}
 0x120   :  { %369 = dma.vmem_to_hbm [thread:$0]  %s367_s14, 128, %s656_s5, [#allocation4]  }
 0x121   :  { %592 = dma.done.wait [#allocation4], 128  }
 0x122   :  { %593 = vsyncadd [#allocation4], 4294967168 }
 0x123   :  { %373 = vsyncpa [#allocation3], 1 }
 0x124   :  { %374 = vsyncpa [#allocation6], 1 }
 0x125   :  { %375 = vsyncpa [#allocation9], 1 }
 0x126   :  { %376 = vsyncpa [#allocation4], 1 }

</bundles_post_ra>
